<compile_context>
chip_gen: v5e
topology: v5e:2x2
jax: 0.10.0
libtpu: 0.0.40
codegen_flags: <defaults>
</compile_context>

<pallas_src>
import functools
import math

import jax
import jax.numpy as jnp
from jax.experimental import pallas as pl
from jax.experimental.pallas import tpu as pltpu


def _round_up(x, m):
    return ((x + m - 1) // m) * m


def _make_mlp_kernel(n_layers, d_pad):
    """Fused kernel: n_layers x (bf16 matmul + f32 bias + ReLU), all in VMEM."""

    def kernel(x_ref, w_ref, b_ref, o_ref):
        h = x_ref[...]  # (TB, d_pad) f32
        for j in range(n_layers):
            # Static slices into the concatenated weight / bias buffers.
            w = w_ref[j * d_pad:(j + 1) * d_pad, :]   # (d_pad, d_pad) bf16
            b = b_ref[j:j + 1, :]                      # (1, d_pad)     f32
            h = jnp.dot(h.astype(jnp.bfloat16), w,
                        preferred_element_type=jnp.float32)
            # Nonlinearity after EVERY layer (including the last), matching
            # the PyTorch module's forward().
            h = jnp.maximum(h + b, 0.0)
        o_ref[...] = h.astype(o_ref.dtype)

    return kernel


def init_densenet_params(layers, key):
    """Xavier-normal weights (nn.init.xavier_normal_), zero biases.

    Weights stored PyTorch-style: (out_features, in_features)."""
    params = []
    n_layers = len(layers) - 1
    assert n_layers >= 1
    for j in range(n_layers):
        fan_in, fan_out = layers[j], layers[j + 1]
        key, wkey = jax.random.split(key)
        std = math.sqrt(2.0 / (fan_in + fan_out))
        w = std * jax.random.normal(wkey, (fan_out, fan_in), dtype=jnp.float32)
        b = jnp.zeros((fan_out,), dtype=jnp.float32)
        params.append((w, b))
    return params


def pack_densenet_params(params, in_dim):
    """One-time packing (call OUTSIDE the per-step path).

    Transposes each weight to (Din, Dout), zero-pads every feature dim to the
    common lane-dense width D_pad (multiple of 128), concatenates all layers
    along the row axis, and casts weights to bf16 for the MXU. Zero padding is
    numerically exact: padded weight rows/cols and biases are zero and
    ReLU(0)=0 propagates through the chain."""
    dims = [in_dim] + [w.shape[0] for w, _ in params]
    d_pad = max(_round_up(d, 128) for d in dims)
    n_layers = len(params)
    w_all = jnp.zeros((n_layers * d_pad, d_pad), jnp.bfloat16)
    b_all = jnp.zeros((n_layers, d_pad), jnp.float32)
    for j, (w, b) in enumerate(params):
        dout, din = w.shape
        w_all = w_all.at[j * d_pad:j * d_pad + din, :dout].set(
            w.T.astype(jnp.bfloat16))
        b_all = b_all.at[j, :dout].set(b)
    return w_all, b_all


@functools.partial(jax.jit, static_argnames=("out_dim",))
def densenet_forward(x, w_all, b_all, *, out_dim):
    """relu(... relu(relu(x @ W1.T + b1) @ W2.T + b2) ...) — single pallas_call."""
    B, din = x.shape
    n_layers, d_pad = b_all.shape

    # Batch tile: <=128 rows so large batches give >=2 grid points (both v7x
    # TensorCores via the "parallel" axis) and avoid v5e vreg spills. At
    # batch=8 this is a single grid point. (On v6e with huge batches a larger
    # tile would amortize step overhead further.)
    TB = min(_round_up(B, 8), 128)
    B_pad = _round_up(B, TB)

    # Zero-pad input to (B_pad, d_pad); padding is exact (see pack_*).
    x_pad = jnp.zeros((B_pad, d_pad), x.dtype).at[:B, :din].set(x)

    bytes_accessed = (
        x_pad.size * x_pad.dtype.itemsize
        + w_all.size * w_all.dtype.itemsize
        + b_all.size * b_all.dtype.itemsize
        + B_pad * d_pad * x.dtype.itemsize
    )
    cost = pl.CostEstimate(
        flops=2 * B_pad * n_layers * d_pad * d_pad,
        transcendentals=0,
        bytes_accessed=bytes_accessed,
    )

    out_pad = pl.pallas_call(
        _make_mlp_kernel(n_layers, d_pad),
        out_shape=jax.ShapeDtypeStruct((B_pad, d_pad), x.dtype),
        grid=(B_pad // TB,),
        in_specs=[
            pl.BlockSpec((TB, d_pad), lambda i: (i, 0)),
            # Concatenated weights / biases: full block, constant index map
            # -> VMEM-resident across the whole grid.
            pl.BlockSpec((n_layers * d_pad, d_pad), lambda i: (0, 0)),
            pl.BlockSpec((n_layers, d_pad), lambda i: (0, 0)),
        ],
        out_specs=pl.BlockSpec((TB, d_pad), lambda i: (i, 0)),
        compiler_params=pltpu.CompilerParams(
            dimension_semantics=("parallel",)
        ),
        cost_estimate=cost,
    )(x_pad, w_all, b_all)

    # Slice away batch + lane padding.
    return out_pad[:B, :out_dim]
    # TODO(synk): normalize=True (BatchNorm1d) and custom out_nonlinearity
    # constructor options are not used in this configuration and not implemented.


if __name__ == "__main__":
    layers = [32, 64, 48, 16]
    batch = 8

    key = jax.random.PRNGKey(0)
    key, xkey = jax.random.split(key)
    x = jax.random.normal(xkey, (batch, layers[0]), dtype=jnp.float32)

    params = init_densenet_params(layers, key)
    # One-time packing, outside the jitted per-call path.
    w_all, b_all = pack_densenet_params(params, layers[0])

    out = densenet_forward(x, w_all, b_all, out_dim=layers[-1])
    out = jax.block_until_ready(out)

    # Reference mirrors the kernel's math (bf16 MXU operands, f32 accumulate,
    # f32 bias + ReLU, nonlinearity after every layer).
    ref = x
    for w, b in params:
        ref = jnp.maximum(
            jnp.dot(ref.astype(jnp.bfloat16), w.T.astype(jnp.bfloat16),
                    preferred_element_type=jnp.float32) + b,
            0.0,
        )

    assert out.shape == (batch, layers[-1])
    assert jnp.allclose(out, ref, atol=1e-2, rtol=1e-2)

    print("KERNEL_OK")
</pallas_src>

<mosaic_0001>
module attributes {stable_mosaic.version = 11 : i64} {
  func.func @kernel(%arg0: i32, %arg1: memref<8x128xf32, #tpu.memory_space<vmem>>, %arg2: memref<384x128xbf16, #tpu.memory_space<vmem>>, %arg3: memref<3x128xf32, #tpu.memory_space<vmem>>, %arg4: memref<8x128xf32, #tpu.memory_space<vmem>>) attributes {dimension_semantics = [#tpu.dimension_semantics<parallel>], iteration_bounds = array<i64: 1>, scalar_prefetch = 0 : i64, scratch_operands = 0 : i64, tpu.core_type = #tpu.core_type<tc>, window_params = [{transform_indices = @transform_0, window_bounds = array<i64: 8, 128>}, {pipeline_mode = #tpu.pipeline_mode<synchronous>, transform_indices = @transform_1, window_bounds = array<i64: 384, 128>}, {pipeline_mode = #tpu.pipeline_mode<synchronous>, transform_indices = @transform_2, window_bounds = array<i64: 3, 128>}, {transform_indices = @transform_3, window_bounds = array<i64: 8, 128>}]} {
    %c0 = arith.constant 0 : index
    %c0_0 = arith.constant 0 : index
    %0 = vector.load %arg1[%c0, %c0_0] : memref<8x128xf32, #tpu.memory_space<vmem>>, vector<8x128xf32>
    %c0_1 = arith.constant 0 : index
    %c0_2 = arith.constant 0 : index
    %1 = vector.load %arg2[%c0_1, %c0_2] : memref<384x128xbf16, #tpu.memory_space<vmem>>, vector<128x128xbf16>
    %c0_3 = arith.constant 0 : index
    %c0_4 = arith.constant 0 : index
    %2 = vector.load %arg3[%c0_3, %c0_4] : memref<3x128xf32, #tpu.memory_space<vmem>>, vector<1x128xf32>
    %3 = arith.truncf %0 : vector<8x128xf32> to vector<8x128xbf16>
    %cst = arith.constant dense<0.000000e+00> : vector<8x128xf32>
    %4 = tpu.matmul %3, %1, %cst {dimension_numbers = #tpu.dot_dimension_numbers<[1], [0], [0], [1], [0, 0, 1, 1], [], []>} : vector<8x128xbf16>, vector<128x128xbf16>, vector<8x128xf32> -> vector<8x128xf32>
    %5 = vector.broadcast %2 : vector<1x128xf32> to vector<8x128xf32>
    %6 = arith.addf %4, %5 : vector<8x128xf32>
    %cst_5 = arith.constant 0.000000e+00 : f32
    %7 = vector.broadcast %cst_5 : f32 to vector<8x128xf32>
    %8 = arith.maximumf %6, %7 : vector<8x128xf32>
    %c128 = arith.constant 128 : index
    %c0_6 = arith.constant 0 : index
    %9 = vector.load %arg2[%c128, %c0_6] : memref<384x128xbf16, #tpu.memory_space<vmem>>, vector<128x128xbf16>
    %c1 = arith.constant 1 : index
    %c0_7 = arith.constant 0 : index
    %10 = vector.load %arg3[%c1, %c0_7] : memref<3x128xf32, #tpu.memory_space<vmem>>, vector<1x128xf32>
    %11 = arith.truncf %8 : vector<8x128xf32> to vector<8x128xbf16>
    %cst_8 = arith.constant dense<0.000000e+00> : vector<8x128xf32>
    %12 = tpu.matmul %11, %9, %cst_8 {dimension_numbers = #tpu.dot_dimension_numbers<[1], [0], [0], [1], [0, 0, 1, 1], [], []>} : vector<8x128xbf16>, vector<128x128xbf16>, vector<8x128xf32> -> vector<8x128xf32>
    %13 = vector.broadcast %10 : vector<1x128xf32> to vector<8x128xf32>
    %14 = arith.addf %12, %13 : vector<8x128xf32>
    %cst_9 = arith.constant 0.000000e+00 : f32
    %15 = vector.broadcast %cst_9 : f32 to vector<8x128xf32>
    %16 = arith.maximumf %14, %15 : vector<8x128xf32>
    %c256 = arith.constant 256 : index
    %c0_10 = arith.constant 0 : index
    %17 = vector.load %arg2[%c256, %c0_10] : memref<384x128xbf16, #tpu.memory_space<vmem>>, vector<128x128xbf16>
    %c2 = arith.constant 2 : index
    %c0_11 = arith.constant 0 : index
    %18 = vector.load %arg3[%c2, %c0_11] : memref<3x128xf32, #tpu.memory_space<vmem>>, vector<1x128xf32>
    %19 = arith.truncf %16 : vector<8x128xf32> to vector<8x128xbf16>
    %cst_12 = arith.constant dense<0.000000e+00> : vector<8x128xf32>
    %20 = tpu.matmul %19, %17, %cst_12 {dimension_numbers = #tpu.dot_dimension_numbers<[1], [0], [0], [1], [0, 0, 1, 1], [], []>} : vector<8x128xbf16>, vector<128x128xbf16>, vector<8x128xf32> -> vector<8x128xf32>
    %21 = vector.broadcast %18 : vector<1x128xf32> to vector<8x128xf32>
    %22 = arith.addf %20, %21 : vector<8x128xf32>
    %cst_13 = arith.constant 0.000000e+00 : f32
    %23 = vector.broadcast %cst_13 : f32 to vector<8x128xf32>
    %24 = arith.maximumf %22, %23 : vector<8x128xf32>
    %c0_14 = arith.constant 0 : index
    %c0_15 = arith.constant 0 : index
    %25 = vector.load %arg4[%c0_14, %c0_15] : memref<8x128xf32, #tpu.memory_space<vmem>>, vector<8x128xf32>
    tpu.vector_store %arg4[%c0_14, %c0_15], %24 {strides = array<i32>} : memref<8x128xf32, #tpu.memory_space<vmem>>, vector<8x128xf32>,
    return
  }
  func.func @transform_0(%arg0: i32) -> (i32, i32) {
    %c0_i32 = arith.constant 0 : i32
    %c0_i32_0 = arith.constant 0 : i32
    return %arg0, %c0_i32 : i32, i32
  }
  func.func @transform_1(%arg0: i32) -> (i32, i32) {
    %c0_i32 = arith.constant 0 : i32
    %c0_i32_0 = arith.constant 0 : i32
    %c0_i32_1 = arith.constant 0 : i32
    return %c0_i32, %c0_i32_0 : i32, i32
  }
  func.func @transform_2(%arg0: i32) -> (i32, i32) {
    %c0_i32 = arith.constant 0 : i32
    %c0_i32_0 = arith.constant 0 : i32
    %c0_i32_1 = arith.constant 0 : i32
    return %c0_i32, %c0_i32_0 : i32, i32
  }
  func.func @transform_3(%arg0: i32) -> (i32, i32) {
    %c0_i32 = arith.constant 0 : i32
    %c0_i32_0 = arith.constant 0 : i32
    return %arg0, %c0_i32 : i32, i32
  }
}

</mosaic_0001>

<bundles_post_ra>
// kernel: densenet_forward.1
= control target key start
LH: loop header
LB: loop body
LE: loop exit
PB: predicated region body
PF: predicated region fallthrough
CT: control target
= control target key end

     0   :  { %8 = vsyncpa [#allocation3], 0  ;;  %s514_s0 = inlined_call_operand.vmem [shape: f32[8,128], index: 0, kind: input, shape index: {}]   ;;  %s515_s1 = inlined_call_operand.hbm [shape: bf16[384,128], index: 1, kind: input, shape index: {}]   ;;  %s516_s2 = inlined_call_operand.vmem [shape: f32[3,128], index: 2, kind: input, shape index: {}]   ;;  %s517_s3 = inlined_call_operand.hbm [shape: f32[8,128], index: 3, kind: output, shape index: {}]  }
   0x1   :  { %9 = vsyncpa [#allocation4], 0  ;;  %s16_s14 = sshll.u32 %s515_s1, 4  ;;  %s472_s15 = smov [#allocation2]   ;;  %s17_s14 = int_to_ptr.hbm [resolvable:$true] %s16_s14 }
   0x2   :  { %s18_s16 = sshll.u32 %s472_s15, 4  ;;  %s473_s17 = smov 64   ;;  %s19_s16 = int_to_ptr.vmem [resolvable:$true] %s18_s16 }
   0x3   :  { %s474_s18 = smov 4  }
   0x4   :  { %24 = dma.hbm_to_vmem [thread:$0]  %s17_s14, 3072, %s19_s16, [#allocation3], %s473_s17, %s473_s17, %s474_s18  }
   0x5   :  { %468 = dma.done.wait [#allocation3], 3072  }
   0x6   :  { %469 = vsyncadd [#allocation3], 4294964224  ;;  %v396_v0 = vld [vmem:[#allocation2 + $0x38] sm:$0xff]  ;;  %v395_v1 = vld [vmem:[#allocation2 + $0x30] sm:$0xff]  ;;  %s475_s25 = smov [#allocation5]   ;;  %s283_s29 = sshll.u32 %s517_s3, 4  ;;  %s284_s29 = int_to_ptr.hbm [resolvable:$true] %s283_s29 }
   0x7   :  { %99 = vmatpush.bf16.msra.mxu0 %v396_v0  ;;  %v404_v2 = vld [vmem:[#allocation2 + $0x78] sm:$0xff]  ;;  %v403_v3 = vld [vmem:[#allocation2 + $0x70] sm:$0xff]  ;;  %v394_v4 = vld [vmem:[#allocation2 + $0x28] sm:$0xff]  ;;  %s281_s26 = sshll.u32 %s475_s25, 4  ;;  %s282_s26 = int_to_ptr.vmem [resolvable:$true] %s281_s26 }
   0x8   :  { %180 = vmatpush.bf16.msra.mxu1 %v404_v2  ;;  %v402_v5 = vld [vmem:[#allocation2 + $0x68] sm:$0xff]  ;;  %v393_v6 = vld [vmem:[#allocation2 + $0x20] sm:$0xff]  ;;  %v392_v8 = vld [vmem:[#allocation2 + $0x18] sm:$0xff] }
   0x9   :  { %v401_v7 = vld [vmem:[#allocation2 + $0x60] sm:$0xff]  ;;  %v400_v9 = vld [vmem:[#allocation2 + $0x58] sm:$0xff]  ;;  %v391_v10 = vld [vmem:[#allocation2 + $0x10] sm:$0xff] }
   0xa   :  { %v399_v11 = vld [vmem:[#allocation2 + $0x50] sm:$0xff]  ;;  %v390_v12 = vld [vmem:[#allocation2 + $0x8] sm:$0xff]  ;;  %v389_v13 = vld [vmem:[#allocation2] sm:$0xff] }
   0xb   :  { %100 = vmatpush.bf16.msra.mxu0 %v395_v1  ;;  %v31_v14 = vld [vmem:[%s514_s0] sm:$0xff]  ;;  %v398_v16 = vld [vmem:[#allocation2 + $0x48] sm:$0xff]  ;;  %v412_v18 = vld [vmem:[#allocation2 + $0xb8] sm:$0xff] }
   0xc   :  { %181 = vmatpush.bf16.msra.mxu1 %v403_v3  ;;  %v49_v15 = vpack.c.bf16 %v31_v14, %v31_v14  ;;  %v397_v17 = vld [vmem:[#allocation2 + $0x40] sm:$0xff]  ;;  %261 = vmatpush.bf16.msra.mxu2 %v412_v18  ;;  %v411_v19 = vld [vmem:[#allocation2 + $0xb0] sm:$0xff]  ;;  %v410_v20 = vld [vmem:[#allocation2 + $0xa8] sm:$0xff] }
   0xd   :  { %v409_v21 = vld [vmem:[#allocation2 + $0xa0] sm:$0xff]  ;;  %v408_v22 = vld [vmem:[#allocation2 + $0x98] sm:$0xff]  ;;  %v407_v23 = vld [vmem:[#allocation2 + $0x90] sm:$0xff] }
   0xe   :  { %v417_v24 = vld [vmem:[%s516_s2] ss:$0 sm:$0xff]  ;;  %v406_v30 = vld [vmem:[#allocation2 + $0x88] sm:$0xff]  ;;  %v418_v32 = vld [vmem:[%s516_s2 + $0x1] ss:$0 sm:$0xff] }
   0xf   :  { %101 = vmatpush.bf16.msra.mxu0 %v394_v4  ;;  %v405_v31 = vld [vmem:[#allocation2 + $0x80] sm:$0xff] }
  0x10   :  { %182 = vmatpush.bf16.msra.mxu1 %v402_v5  ;;  %262 = vmatpush.bf16.msra.mxu2 %v411_v19  ;;  %v419_v38 = vld [vmem:[%s516_s2 + $0x2] ss:$0 sm:$0xff] }
  0x13   :  { %102 = vmatpush.bf16.msra.mxu0 %v393_v6 }
  0x14   :  { %183 = vmatpush.bf16.msra.mxu1 %v401_v7  ;;  %263 = vmatpush.bf16.msra.mxu2 %v410_v20 }
  0x17   :  { %103 = vmatpush.bf16.msra.mxu0 %v392_v8 }
  0x18   :  { %184 = vmatpush.bf16.msra.mxu1 %v400_v9  ;;  %264 = vmatpush.bf16.msra.mxu2 %v409_v21 }
  0x1b   :  { %104 = vmatpush.bf16.msra.mxu0 %v391_v10 }
  0x1c   :  { %185 = vmatpush.bf16.msra.mxu1 %v399_v11  ;;  %265 = vmatpush.bf16.msra.mxu2 %v408_v22 }
  0x1f   :  { %105 = vmatpush.bf16.msra.mxu0 %v390_v12 }
  0x20   :  { %186 = vmatpush.bf16.msra.mxu1 %v398_v16  ;;  %266 = vmatpush.bf16.msra.mxu2 %v407_v23 }
  0x23   :  { %106 = vmatpush.bf16.msra.mxu0 %v389_v13 }
  0x24   :  { %187 = vmatpush.bf16.msra.mxu1 %v397_v17  ;;  %267 = vmatpush.bf16.msra.mxu2 %v406_v30 }
  0x26   :  { %107 = vmatmul.bf16.vlgmr.msra.gmra.mxu0 %v49_v15 }
  0x28   :  { %268 = vmatpush.bf16.msra.mxu2 %v405_v31 }
  0xa3   :  { %v108_v25 = vpop.f32.mrf.mxu0 }
  0xa4   :  { %v109_v26 = vadd.f32 %v417_v24, %v108_v25 }
  0xa6   :  { %v112_v27 = vmax.f32 %v109_v26, 0.0 }
  0xa8   :  { %v130_v28 = vpack.c.bf16 %v112_v27, %v112_v27 }
  0xaa   :  { %188 = vmatmul.bf16.vlgmr.msra.gmra.mxu1 %v130_v28 }
  0xab   :  { %v110_v29 = vpop.f32.mrf.mxu0 }
 0x127   :  { %v189_v33 = vpop.f32.mrf.mxu1 }
 0x128   :  { %v190_v34 = vadd.f32 %v418_v32, %v189_v33 }
 0x12a   :  { %v193_v35 = vmax.f32 %v190_v34, 0.0 }
 0x12c   :  { %v211_v36 = vpack.c.bf16 %v193_v35, %v193_v35 }
 0x12e   :  { %269 = vmatmul.bf16.vlgmr.msra.gmra.mxu2 %v211_v36 }
 0x12f   :  { %v191_v37 = vpop.f32.mrf.mxu1 }
 0x1b1   :  { %v270_v39 = vpop.f32.mrf.mxu2 }
 0x1b2   :  { %v271_v40 = vadd.f32 %v419_v38, %v270_v39 }
 0x1b4   :  { %v274_v41 = vmax.f32 %v271_v40, 0.0 }
 0x1b6   :  { %275 = vst [vmem:[#allocation5] sm:$0xff] %v274_v41 }
 0x1b7   :  { %286 = dma.vmem_to_hbm [thread:$0]  %s282_s26, 128, %s284_s29, [#allocation4]  }
 0x1b9   :  { %v272_v42 = vpop.f32.mrf.mxu2 }
 0x1ba   :  { %470 = dma.done.wait [#allocation4], 128  }
 0x1bb   :  { %471 = vsyncadd [#allocation4], 4294967168 }
 0x1bc   :  { %291 = vsyncpa [#allocation3], 1 }
 0x1bd   :  { %292 = vsyncpa [#allocation4], 1 }

</bundles_post_ra>
